<compile_context>
chip_gen: v6e
topology: v6e:2x2x1
jax: 0.10.0
libtpu: 0.0.40
codegen_flags: <defaults>
</compile_context>

<pallas_src>
import jax
import jax.numpy as jnp
from jax.experimental import pallas as pl
from jax.experimental.pallas import tpu as pltpu

_LANE = 128        # class axis padded to a multiple of the lane width
_SUBLANE = 8       # batch tiles are multiples of the sublane width
_NEG_INF = -1e30   # bias on padded (fake) classes -> exp() underflows to 0


def _round_up(x, m):
    return ((x + m - 1) // m) * m


# --------------------------------------------------------------------------
# Kernels
# --------------------------------------------------------------------------
def _log_softmax_to(logits, o_ref):
    # Numerically stable log_softmax over the (lane-padded) class axis.
    # Padded classes carry a -1e30 bias, so exp(shifted) == 0 there and the
    # normalizer is exact over the real classes.
    m = jnp.max(logits, axis=-1, keepdims=True)
    shifted = logits - m
    lse = jnp.log(jnp.sum(jnp.exp(shifted), axis=-1, keepdims=True))
    o_ref[...] = (shifted - lse).astype(o_ref.dtype)


def _make_kernel(n_class_tiles, tc):
    if n_class_tiles == 1:
        # Whole (padded) class axis resident: single matmul + softmax.
        def kernel(x_ref, wt_ref, b_ref, o_ref):
            logits = jnp.dot(x_ref[...], wt_ref[...],
                             preferred_element_type=jnp.float32) + b_ref[...]
            _log_softmax_to(logits, o_ref)
        return kernel

    # Class-tiled path: stream (F, tc) weight chunks over the class grid axis,
    # assemble the row tile's full logits in a VMEM scratch, finalize the
    # log-softmax (and the output write) at the last class step.
    def kernel(x_ref, wt_ref, b_ref, o_ref, logits_ref):
        j = pl.program_id(1)
        chunk = jnp.dot(x_ref[...], wt_ref[...],
                        preferred_element_type=jnp.float32) + b_ref[...]
        off = pl.multiple_of(j * tc, _LANE)
        logits_ref[:, pl.ds(off, tc)] = chunk

        @pl.when(j == n_class_tiles - 1)
        def _():
            _log_softmax_to(logits_ref[...], o_ref)

    return kernel


# --------------------------------------------------------------------------
# Parameter prep (one-time, hoisted out of the forward path)
# --------------------------------------------------------------------------
def prepare_class_predictor_params(weight, bias, param_dtype=jnp.bfloat16):
    """weight: (n_classes, nz_feat) nn.Linear layout; bias: (n_classes,).

    Returns lane-dense params:
      wt: (nz_feat, C_pad) in `param_dtype` (bf16 default: halves HBM/VMEM
          traffic and uses the native bf16 MXU; matmul accumulates in f32)
      b2: (1, C_pad) f32, padded entries = -1e30
    """
    C, F = weight.shape
    C_pad = _round_up(max(C, _LANE), _LANE)
    wt = jnp.zeros((F, C_pad), param_dtype).at[:, :C].set(
        jnp.asarray(weight).T.astype(param_dtype))
    b2 = jnp.full((1, C_pad), _NEG_INF, jnp.float32).at[0, :C].set(
        jnp.asarray(bias).astype(jnp.float32))
    return wt, b2


# --------------------------------------------------------------------------
# Tiling / VMEM budgeting
# --------------------------------------------------------------------------
def _vmem_budget_bytes():
    # Generation-aware scoped-VMEM budget: ~3/4 of physical VMEM, capped at
    # 100 MiB (v5e/v6e: 128 MiB -> 96 MiB; v7x: 64 MiB -> 48 MiB).
    try:
        cap = int(pltpu.get_tpu_info().vmem_capacity_bytes)
    except Exception:
        cap = 64 << 20  # conservative fallback (v7x per-core VMEM)
    return min((cap * 3) // 4, 100 << 20)


def _choose_tiles(B, F, C_pad, in_itemsize, out_itemsize, vmem_budget):
    # --- class tile -------------------------------------------------------
    # Keep the whole class axis resident (single-buffered weight) if it fits
    # in ~half the budget; otherwise stream multiple-of-128 chunks that divide
    # C_pad (double-buffered), finalizing via the logits scratch.
    if F * C_pad * in_itemsize <= vmem_budget // 2:
        TC = C_pad
    else:
        k = C_pad // _LANE
        TC = _LANE
        for d in sorted((d for d in range(1, k + 1) if k % d == 0),
                        reverse=True):
            cand = _LANE * d
            if cand < C_pad and 2 * F * cand * in_itemsize <= vmem_budget // 4:
                TC = cand
                break
    n_ct = C_pad // TC

    # --- batch tile -------------------------------------------------------
    w_bufs = 1 if n_ct == 1 else 2
    fixed = w_bufs * (F * TC * in_itemsize + TC * 4) + (2 << 20)
    per_row = (2 * F * in_itemsize            # double-buffered feats tile
               + 2 * C_pad * out_itemsize     # double-buffered output tile
               + (C_pad * 4 if n_ct > 1 else 0))  # f32 logits scratch
    TB = min(_round_up(B, _SUBLANE), 1024)
    while TB > _SUBLANE and fixed + TB * per_row > vmem_budget:
        TB = max(_round_up(TB // 2, _SUBLANE), _SUBLANE)
    # Ensure >= 2 row tiles when B permits, so "parallel" actually shards the
    # grid across v7x's 2 TensorCores (a single-step grid leaves one TC idle).
    if B >= 16:
        TB = min(TB, _round_up(pl.cdiv(B, 2), _SUBLANE))
    return TB, TC, n_ct


# --------------------------------------------------------------------------
# Forward
# --------------------------------------------------------------------------
def class_predictor(feats, wt, b2, n_classes, *, out_dtype=jnp.float32,
                    trim=True):
    """feats: (B, nz_feat); wt/b2 from prepare_class_predictor_params.

    Returns log-probabilities of shape (B, n_classes) (or the padded
    (B, C_pad) slab if trim=False, letting the consumer index it and avoiding
    the class-slice copy entirely).
    """
    B, F = feats.shape
    Fw, C_pad = wt.shape
    assert Fw == F, "weight/feature dim mismatch"
    assert n_classes <= C_pad

    in_itemsize = jnp.dtype(wt.dtype).itemsize
    out_itemsize = jnp.dtype(out_dtype).itemsize
    budget = _vmem_budget_bytes()
    TB, TC, n_ct = _choose_tiles(B, F, C_pad, in_itemsize, out_itemsize,
                                 budget)

    # Activations follow the parameter dtype (bf16 by default) -> halved
    # streamed bytes; accumulation and softmax stay in f32.
    x = feats.astype(wt.dtype)

    grid = (pl.cdiv(B, TB), n_ct)

    w_bufs = 1 if n_ct == 1 else 2
    needed = (w_bufs * (F * TC * in_itemsize + TC * 4)
              + 2 * TB * F * in_itemsize
              + 2 * TB * C_pad * out_itemsize
              + (TB * C_pad * 4 if n_ct > 1 else 0)
              + (2 << 20))
    vmem_bytes = int(min(max(needed, 16 << 20), budget))

    if n_ct == 1:
        # Resident weight/bias: constant block, never re-fetched ->
        # single-buffer them (halves their VMEM footprint).
        w_spec = pl.BlockSpec((F, TC), lambda i, j: (0, j),
                              pipeline_mode=pl.Buffered(1))
        b_spec = pl.BlockSpec((1, TC), lambda i, j: (0, j),
                              pipeline_mode=pl.Buffered(1))
        scratch = []
    else:
        w_spec = pl.BlockSpec((F, TC), lambda i, j: (0, j))
        b_spec = pl.BlockSpec((1, TC), lambda i, j: (0, j))
        scratch = [pltpu.VMEM((TB, C_pad), jnp.float32)]

    out = pl.pallas_call(
        _make_kernel(n_ct, TC),
        out_shape=jax.ShapeDtypeStruct((B, C_pad), out_dtype),
        grid=grid,
        in_specs=[
            pl.BlockSpec((TB, F), lambda i, j: (i, 0)),  # streamed batch tiles
            w_spec,                                      # weight (chunked)
            b_spec,                                      # bias   (chunked)
        ],
        out_specs=pl.BlockSpec((TB, C_pad), lambda i, j: (i, 0)),
        scratch_shapes=scratch,
        compiler_params=pltpu.CompilerParams(
            dimension_semantics=("parallel", "arbitrary"),
            vmem_limit_bytes=vmem_bytes),
    )(x, wt, b2)

    return out[:, :n_classes] if trim else out


def class_predictor_ref(feats, weight, bias):
    logits = feats @ weight.T + bias
    return jax.nn.log_softmax(logits, axis=-1)


if __name__ == "__main__":
    key = jax.random.PRNGKey(0)
    k_x, k_w, k_b = jax.random.split(key, 3)

    B, nz_feat, max_object_classes = 8, 32, 16

    feats = jax.random.normal(k_x, (B, nz_feat), dtype=jnp.float32)
    # Synthetic params, shapes matching nn.Linear(nz_feat, max_object_classes).
    bound = 1.0 / (nz_feat ** 0.5)
    weight = jax.random.uniform(k_w, (max_object_classes, nz_feat),
                                minval=-bound, maxval=bound, dtype=jnp.float32)
    bias = jax.random.uniform(k_b, (max_object_classes,),
                              minval=-bound, maxval=bound, dtype=jnp.float32)

    ref = class_predictor_ref(feats, weight, bias)

    # f32 parameter path (bit-accurate at the tight tolerance).
    wt32, b32 = prepare_class_predictor_params(weight, bias,
                                               param_dtype=jnp.float32)
    out32 = jax.block_until_ready(
        class_predictor(feats, wt32, b32, max_object_classes))
    assert out32.shape == (B, max_object_classes)
    assert jnp.allclose(out32, ref, atol=1e-5, rtol=1e-5), "f32 mismatch"

    # Default bf16 parameter/activation path (f32 accumulation + f32 softmax).
    wt16, b16 = prepare_class_predictor_params(weight, bias)
    out16 = jax.block_until_ready(
        class_predictor(feats, wt16, b16, max_object_classes))
    assert out16.shape == (B, max_object_classes)
    assert jnp.allclose(out16, ref, atol=3e-2, rtol=3e-2), "bf16 mismatch"

    print("KERNEL_OK")
</pallas_src>

<mosaic_0001>
module attributes {stable_mosaic.version = 11 : i64} {
  func.func @kernel(%arg0: i32, %arg1: i32, %arg2: memref<8x32xf32, #tpu.memory_space<vmem>>, %arg3: memref<32x128xf32, #tpu.memory_space<vmem>>, %arg4: memref<1x128xf32, #tpu.memory_space<vmem>>, %arg5: memref<8x128xf32, #tpu.memory_space<vmem>>) attributes {dimension_semantics = [#tpu.dimension_semantics<parallel>, #tpu.dimension_semantics<arbitrary>], iteration_bounds = array<i64: 1, 1>, scalar_prefetch = 0 : i64, scratch_operands = 0 : i64, tpu.core_type = #tpu.core_type<tc>, window_params = [{transform_indices = @transform_0, window_bounds = array<i64: 8, 32>}, {pipeline_mode = #tpu.pipeline_mode<synchronous>, transform_indices = @transform_1, window_bounds = array<i64: 32, 128>}, {pipeline_mode = #tpu.pipeline_mode<synchronous>, transform_indices = @transform_2, window_bounds = array<i64: 1, 128>}, {transform_indices = @transform_3, window_bounds = array<i64: 8, 128>}]} {
    %c0 = arith.constant 0 : index
    %c0_0 = arith.constant 0 : index
    %0 = vector.load %arg2[%c0, %c0_0] : memref<8x32xf32, #tpu.memory_space<vmem>>, vector<8x32xf32>
    %c0_1 = arith.constant 0 : index
    %c0_2 = arith.constant 0 : index
    %1 = vector.load %arg3[%c0_1, %c0_2] : memref<32x128xf32, #tpu.memory_space<vmem>>, vector<32x128xf32>
    %cst = arith.constant dense<0.000000e+00> : vector<8x128xf32>
    %2 = tpu.matmul %0, %1, %cst {dimension_numbers = #tpu.dot_dimension_numbers<[1], [0], [0], [1], [0, 0, 1, 1], [], []>} : vector<8x32xf32>, vector<32x128xf32>, vector<8x128xf32> -> vector<8x128xf32>
    %c0_3 = arith.constant 0 : index
    %c0_4 = arith.constant 0 : index
    %3 = vector.load %arg4[%c0_3, %c0_4] : memref<1x128xf32, #tpu.memory_space<vmem>>, vector<1x128xf32>
    %4 = vector.broadcast %3 : vector<1x128xf32> to vector<8x128xf32>
    %5 = arith.addf %2, %4 : vector<8x128xf32>
    %cst_5 = arith.constant dense<0xFF800000> : vector<8xf32>
    %6 = vector.multi_reduction <maximumf>, %5, %cst_5 [1] : vector<8x128xf32> to vector<8xf32>
    %7 = vector.shape_cast %6 : vector<8xf32> to vector<8x1xf32>
    %8 = vector.broadcast %7 : vector<8x1xf32> to vector<8x128xf32>
    %9 = arith.subf %5, %8 : vector<8x128xf32>
    %10 = math.exp %9 : vector<8x128xf32>
    %cst_6 = arith.constant dense<0.000000e+00> : vector<8xf32>
    %11 = vector.multi_reduction <add>, %10, %cst_6 [1] : vector<8x128xf32> to vector<8xf32>
    %12 = vector.shape_cast %11 : vector<8xf32> to vector<8x1xf32>
    %13 = math.log %12 : vector<8x1xf32>
    %14 = vector.broadcast %13 : vector<8x1xf32> to vector<8x128xf32>
    %15 = arith.subf %9, %14 : vector<8x128xf32>
    %c0_7 = arith.constant 0 : index
    %c0_8 = arith.constant 0 : index
    %16 = vector.load %arg5[%c0_7, %c0_8] : memref<8x128xf32, #tpu.memory_space<vmem>>, vector<8x128xf32>
    tpu.vector_store %arg5[%c0_7, %c0_8], %15 {strides = array<i32>} : memref<8x128xf32, #tpu.memory_space<vmem>>, vector<8x128xf32>,
    return
  }
  func.func @transform_0(%arg0: i32, %arg1: i32) -> (i32, i32) {
    %c0_i32 = arith.constant 0 : i32
    %c0_i32_0 = arith.constant 0 : i32
    return %arg0, %c0_i32 : i32, i32
  }
  func.func @transform_1(%arg0: i32, %arg1: i32) -> (i32, i32) {
    %c0_i32 = arith.constant 0 : i32
    %c0_i32_0 = arith.constant 0 : i32
    return %c0_i32, %arg1 : i32, i32
  }
  func.func @transform_2(%arg0: i32, %arg1: i32) -> (i32, i32) {
    %c0_i32 = arith.constant 0 : i32
    %c0_i32_0 = arith.constant 0 : i32
    return %c0_i32, %arg1 : i32, i32
  }
  func.func @transform_3(%arg0: i32, %arg1: i32) -> (i32, i32) {
    %c0_i32 = arith.constant 0 : i32
    %c0_i32_0 = arith.constant 0 : i32
    return %arg0, %c0_i32 : i32, i32
  }
}

</mosaic_0001>

<bundles_post_ra>
// kernel: tpu_custom_call.1
= control target key start
LH: loop header
LB: loop body
LE: loop exit
PB: predicated region body
PF: predicated region fallthrough
CT: control target
= control target key end

     0   :  { %8 = vsyncpa [#allocation3], 0  ;;  %s288_s0 = inlined_call_operand.hbm [shape: f32[8,32], index: 0, kind: input, shape index: {}]   ;;  %s289_s1 = inlined_call_operand.hbm [shape: f32[32,128], index: 1, kind: input, shape index: {}]   ;;  %s290_s2 = inlined_call_operand.vmem [shape: f32[1,128], index: 2, kind: input, shape index: {}]   ;;  %s291_s3 = inlined_call_operand.hbm [shape: f32[8,128], index: 3, kind: output, shape index: {}]  }
   0x1   :  { %9 = vsyncpa [#allocation6], 0 }
   0x2   :  { %10 = vsyncpa [#allocation4], 0  ;;  %s249_s12 = smov [#allocation2]   ;;  %s250_s14 = smov [#allocation5]  }
   0x3   :  { %s17_s13 = sshll.u32 %s249_s12, 4  ;;  %s26_s15 = sshll.u32 %s250_s14, 4  ;;  %s18_s13 = int_to_ptr.vmem [resolvable:$true] %s17_s13  ;;  %s27_s15 = int_to_ptr.vmem [resolvable:$true] %s26_s15 }
   0x4   :  { %s191_s16 = scalar_lea.vmem %s18_s13, 128  ;;  %p196_p1 = scmp.lt.s32.totalorder %s18_s13, %s18_s13 }
   0x5   :  { %p192_p0 = scmp.ne.s32.totalorder %s18_s13, %s191_s16  ;;  %p197_p2 = scmp.lt.s32.totalorder %s191_s16, %s191_s16 }
   0x7   :  { %p198_p3 = por %p197_p2, %p196_p1 }
   0x9   :  { %p199_p4 = pnand %p198_p3, %p192_p0 }
   0xb   :  { %202 = shalt.err (!%p199_p4)
}
   0xc   :  { %20 = dma.hbm_to_vmem [thread:$0]  %s288_s0, 128, %s18_s13, [#allocation3]  }
   0xd   :  { %s211_s19 = scalar_lea.vmem %s27_s15, 512  ;;  %p216_p6 = scmp.lt.s32.totalorder %s27_s15, %s27_s15 }
   0xe   :  { %p212_p5 = scmp.ne.s32.totalorder %s27_s15, %s211_s19  ;;  %p217_p7 = scmp.lt.s32.totalorder %s211_s19, %s211_s19 }
  0x10   :  { %p218_p8 = por %p217_p7, %p216_p6 }
  0x12   :  { %p219_p9 = pnand %p218_p8, %p212_p5 }
  0x14   :  { %222 = shalt.err (!%p219_p9)
}
  0x15   :  { %s251_s20 = smov 128   ;;  %s252_s21 = smov 8  }
  0x16   :  { %32 = dma.hbm_to_vmem [thread:$0]  %s289_s1, 512, %s27_s15, [#allocation6], %s251_s20, %s251_s20, %s252_s21  }
  0x17   :  { %243 = dma.done.wait [#allocation3], 128  }
  0x18   :  { %244 = vsyncadd [#allocation3], 4294967168 }
  0x19   :  { %245 = dma.done.wait [#allocation6], 512  }
  0x1a   :  { %246 = vsyncadd [#allocation6], 4294966784  ;;  %v253_v0 = vmov 0.0   ;;  %vm254_vm0 = vmmov 0   ;;  %v45_v1 = vld [vmem:[#allocation5 + $0x18] sm:$0xff]  ;;  %v44_v2 = vld [vmem:[#allocation5 + $0x10] sm:$0xff] }
  0x1b   :  { %161 = vmatprep.subr.mxu0 %v253_v0  ;;  %169 = vmatprep.mubr.msk.f32.mxu0 %vm254_vm0, %v253_v0  ;;  %v43_v3 = vld [vmem:[#allocation5 + $0x8] sm:$0xff]  ;;  %v42_v4 = vld [vmem:[#allocation5] sm:$0xff]  ;;  %v41_v5 = vld [vmem:[#allocation2] sm:$0xff]  ;;  %vm53_vm1 = vcmask 261120   ;;  %s255_s24 = smov [#allocation7]  }
  0x1c   :  { %162 = vmatpush3.msra.mxu0 %v45_v1  ;;  %v154_v6 = vld [vmem:[%s290_s2] ss:$0 sm:$0xff]  ;;  %s144_s25 = sshll.u32 %s255_s24, 4  ;;  %s145_s25 = int_to_ptr.vmem [resolvable:$true] %s144_s25 }
  0x1d   :  { %163 = vmatprep.subr.mxu0 %v253_v0  ;;  %s223_s2 = scalar_lea.vmem %s145_s25, 128  ;;  %p228_p11 = scmp.lt.s32.totalorder %s145_s25, %s145_s25 }
  0x1e   :  { %164 = vmatpush3.msra.mxu0 %v44_v2  ;;  %p224_p10 = scmp.ne.s32.totalorder %s145_s25, %s223_s2  ;;  %p229_p12 = scmp.lt.s32.totalorder %s223_s2, %s223_s2 }
  0x1f   :  { %165 = vmatprep.subr.mxu0 %v253_v0 }
  0x20   :  { %166 = vmatpush3.msra.mxu0 %v43_v3  ;;  %p230_p13 = por %p229_p12, %p228_p11 }
  0x21   :  { %167 = vmatprep.subr.mxu0 %v253_v0 }
  0x22   :  { %168 = vmatpush3.msra.mxu0 %v42_v4  ;;  %p231_p0 = pnand %p230_p13, %p224_p10 }
  0x23   :  { %170 = vmatmul.mubr.msk.f32.vlgmr.msra.gmra.mxu0 %vm53_vm1, %v41_v5 }
  0xe3   :  { %v123_v7 = vpop.f32.mrf.mxu0 }
  0xe4   :  { %v124_v8 = vadd.f32 %v154_v6, %v123_v7 }
  0xe5   :  { %v171_v9 = vpop.f32.mrf.mxu0 }
  0xe6   :  { %127 = vmax.xlane.f32.xlu0 %v124_v8 }
 0x16f   :  { %v128_v10 = vpop.xlane.xlu0 %127 }
 0x170   :  { %v129_v11 = vsub.f32 %v124_v8, %v128_v10 }
 0x172   :  { %v130_v12 = vmul.f32 1.442695, %v129_v11 }
 0x174   :  { %179 = vpow2.f32 %v130_v12 }
 0x181   :  { %v180_v13 = vpop.eup %179 }
 0x182   :  { %132 = vadd.xlane.f32.xlu0 %v180_v13 }
 0x20b   :  { %v133_v14 = vpop.xlane.xlu0 %132 }
 0x20c   :  { %181 = vlog2.f32 %v133_v14 }
 0x219   :  { %v182_v15 = vpop.eup %181 }
 0x21a   :  { %v135_v16 = vmul.f32 0.6931472, %v182_v15 }
 0x21c   :  { %v136_v17 = vsub.f32 %v129_v11, %v135_v16 }
 0x21e   :  { %137 = vst [vmem:[#allocation7] sm:$0xff] %v136_v17 }
 0x21f   :  { %234 = shalt.err (!%p231_p0)
}
 0x220   :  { %147 = dma.vmem_to_hbm [thread:$0]  %s145_s25, 128, %s291_s3, [#allocation4]  }
 0x221   :  { %247 = dma.done.wait [#allocation4], 128  }
 0x222   :  { %248 = vsyncadd [#allocation4], 4294967168 }
 0x223   :  { %151 = vsyncpa [#allocation3], 1 }
 0x224   :  { %152 = vsyncpa [#allocation6], 1 }
 0x225   :  { %153 = vsyncpa [#allocation4], 1 }

</bundles_post_ra>
